<compile_context>
chip_gen: v5e
topology: v5e:2x2
jax: 0.10.0
libtpu: 0.0.40
codegen_flags: <defaults>
</compile_context>

<pallas_src>
import jax
import jax.numpy as jnp
from jax.experimental import pallas as pl
from jax.experimental.pallas import tpu as pltpu

DROPOUT_P = 0.3


def _fwd_kernel(u_ref, x_ref, o_ref):
    # u_ref, x_ref : (N0, N1) float32 in VMEM (batch dim squeezed by BlockSpec)
    # o_ref        : (1, 128) float32 in VMEM (per-instance scalar, lane-dense)
    x = x_ref[...]

    # dropout(p=0.3, training=True): keep w.p. (1-p), scale kept values by 1/(1-p)
    keep = u_ref[...] >= DROPOUT_P
    r1 = jnp.where(keep, x * (1.0 / (1.0 - DROPOUT_P)), 0.0)

    # softmax over dim=0 (per column), numerically stabilized
    m = jnp.max(r1, axis=0, keepdims=True)        # (1, N1)
    e = jnp.exp(r1 - m)                           # (N0, N1)
    s = jnp.sum(e, axis=0, keepdims=True)         # (1, N1) column denominators

    # fused tail: sum(mean(e/s, dim=1)) = sum_cols(colsum(e) / s) / N1,
    # and colsum(e) == s, so only the (1, N1) row is normalized.
    n1 = x_ref.shape[1]
    r4 = jnp.sum(s * (1.0 / s)) * (1.0 / n1)      # scalar (analytically 1.0)

    o_ref[...] = jnp.full(o_ref.shape, r4, dtype=o_ref.dtype)


def model_forward_batched(x, key):
    """x: (B, N0, N1) float array. Returns (B,) float32, one module output per instance."""
    x = jnp.asarray(x, dtype=jnp.float32)
    B, N0, N1 = x.shape
    # Dropout uniforms generated host-side (keeps the kernel free of TPU-only
    # PRNG primitives and gives a fresh mask per call via the key).
    u = jax.random.uniform(key, (B, N0, N1), dtype=jnp.float32)

    out = pl.pallas_call(
        _fwd_kernel,
        out_shape=jax.ShapeDtypeStruct((B, 1, 128), jnp.float32),
        grid=(B,),
        in_specs=[
            pl.BlockSpec((None, N0, N1), lambda b: (b, 0, 0)),   # uniforms
            pl.BlockSpec((None, N0, N1), lambda b: (b, 0, 0)),   # x
        ],
        out_specs=pl.BlockSpec((None, 1, 128), lambda b: (b, 0, 0)),
        compiler_params=pltpu.CompilerParams(
            dimension_semantics=("parallel",),
        ),
    )(u, x)
    return out[:, 0, 0]


def model_forward(x, key):
    """Exact module signature: 2-D x -> scalar float32."""
    return model_forward_batched(x[None], key)[0]


if __name__ == "__main__":
    key = jax.random.PRNGKey(0)
    kx, kmask = jax.random.split(key)

    # Shapes implied by the module's forward: a 2-D (seq=8, hidden=32) tensor;
    # batch a few instances per pallas_call to amortize launch overhead.
    B, N0, N1 = 4, 8, 32
    xb = jax.random.normal(kx, (B, N0, N1), dtype=jnp.float32)

    out_b = model_forward_batched(xb, kmask)
    jax.block_until_ready(out_b)

    out_1 = model_forward(xb[0], kmask)
    jax.block_until_ready(out_1)

    # Sanity: softmax over dim=0 makes every column sum to 1, so
    # sum(mean(softmax, dim=1)) == N1 / N1 == 1.0 (up to fp) for any input/mask.
    assert out_b.shape == (B,), out_b.shape
    assert bool(jnp.all(jnp.abs(out_b - 1.0) < 1e-4)), out_b
    assert abs(float(out_1) - 1.0) < 1e-4, float(out_1)

    print("KERNEL_OK")
</pallas_src>

<mosaic_0001>
module attributes {stable_mosaic.version = 11 : i64} {
  func.func @_fwd_kernel(%arg0: i32, %arg1: memref<1x8x32xf32, #tpu.memory_space<vmem>>, %arg2: memref<1x8x32xf32, #tpu.memory_space<vmem>>, %arg3: memref<1x1x128xf32, #tpu.memory_space<vmem>>) attributes {dimension_semantics = [#tpu.dimension_semantics<parallel>], iteration_bounds = array<i64: 4>, scalar_prefetch = 0 : i64, scratch_operands = 0 : i64, tpu.core_type = #tpu.core_type<tc>, window_params = [{transform_indices = @transform_0, window_bounds = array<i64: 1, 8, 32>}, {transform_indices = @transform_1, window_bounds = array<i64: 1, 8, 32>}, {transform_indices = @transform_2, window_bounds = array<i64: 1, 1, 128>}]} {
    %c0 = arith.constant 0 : index
    %c0_0 = arith.constant 0 : index
    %c0_1 = arith.constant 0 : index
    %0 = vector.load %arg2[%c0, %c0_0, %c0_1] : memref<1x8x32xf32, #tpu.memory_space<vmem>>, vector<1x8x32xf32>
    %1 = vector.shape_cast %0 : vector<1x8x32xf32> to vector<8x32xf32>
    %c0_2 = arith.constant 0 : index
    %c0_3 = arith.constant 0 : index
    %c0_4 = arith.constant 0 : index
    %2 = vector.load %arg1[%c0_2, %c0_3, %c0_4] : memref<1x8x32xf32, #tpu.memory_space<vmem>>, vector<1x8x32xf32>
    %3 = vector.shape_cast %2 : vector<1x8x32xf32> to vector<8x32xf32>
    %cst = arith.constant 3.000000e-01 : f32
    %4 = vector.broadcast %cst : f32 to vector<8x32xf32>
    %5 = arith.cmpf oge, %3, %4 : vector<8x32xf32>
    %cst_5 = arith.constant 1.42857146 : f32
    %6 = vector.broadcast %cst_5 : f32 to vector<8x32xf32>
    %7 = arith.mulf %1, %6 : vector<8x32xf32>
    %cst_6 = arith.constant 0.000000e+00 : f32
    %8 = vector.broadcast %cst_6 : f32 to vector<8x32xf32>
    %9 = arith.select %5, %7, %8 : vector<8x32xi1>, vector<8x32xf32>
    %cst_7 = arith.constant dense<0xFF800000> : vector<32xf32>
    %10 = vector.multi_reduction <maximumf>, %9, %cst_7 [0] : vector<8x32xf32> to vector<32xf32>
    %11 = vector.shape_cast %10 : vector<32xf32> to vector<1x32xf32>
    %12 = vector.broadcast %11 : vector<1x32xf32> to vector<8x32xf32>
    %13 = arith.subf %9, %12 : vector<8x32xf32>
    %14 = math.exp %13 : vector<8x32xf32>
    %cst_8 = arith.constant dense<0.000000e+00> : vector<32xf32>
    %15 = vector.multi_reduction <add>, %14, %cst_8 [0] : vector<8x32xf32> to vector<32xf32>
    %16 = vector.shape_cast %15 : vector<32xf32> to vector<1x32xf32>
    %cst_9 = arith.constant 1.000000e+00 : f32
    %17 = vector.broadcast %cst_9 : f32 to vector<1x32xf32>
    %18 = arith.divf %17, %16 : vector<1x32xf32>
    %19 = arith.mulf %16, %18 : vector<1x32xf32>
    %20 = vector.shape_cast %19 : vector<1x32xf32> to vector<1x1x32xf32>
    %cst_10 = arith.constant dense<0.000000e+00> : vector<1xf32>
    %21 = vector.multi_reduction <add>, %20, %cst_10 [1, 2] : vector<1x1x32xf32> to vector<1xf32>
    %22 = vector.shape_cast %21 : vector<1xf32> to vector<1x1x1xf32>
    %23 = vector.extract %22[0, 0, 0] : f32 from vector<1x1x1xf32>
    %cst_11 = arith.constant 3.125000e-02 : f32
    %24 = arith.mulf %23, %cst_11 : f32
    %25 = vector.broadcast %24 : f32 to vector<1x128xf32>
    %c0_12 = arith.constant 0 : index
    %c0_13 = arith.constant 0 : index
    %c0_14 = arith.constant 0 : index
    %26 = vector.load %arg3[%c0_12, %c0_13, %c0_14] : memref<1x1x128xf32, #tpu.memory_space<vmem>>, vector<1x1x128xf32>
    %27 = vector.shape_cast %26 : vector<1x1x128xf32> to vector<1x128xf32>
    %28 = vector.shape_cast %25 : vector<1x128xf32> to vector<1x1x128xf32>
    tpu.vector_store %arg3[%c0_12, %c0_13, %c0_14], %28 {strides = array<i32>} : memref<1x1x128xf32, #tpu.memory_space<vmem>>, vector<1x1x128xf32>,
    return
  }
  func.func @transform_0(%arg0: i32) -> (i32, i32, i32) {
    %c0_i32 = arith.constant 0 : i32
    %c0_i32_0 = arith.constant 0 : i32
    %c0_i32_1 = arith.constant 0 : i32
    return %arg0, %c0_i32, %c0_i32_0 : i32, i32, i32
  }
  func.func @transform_1(%arg0: i32) -> (i32, i32, i32) {
    %c0_i32 = arith.constant 0 : i32
    %c0_i32_0 = arith.constant 0 : i32
    %c0_i32_1 = arith.constant 0 : i32
    return %arg0, %c0_i32, %c0_i32_0 : i32, i32, i32
  }
  func.func @transform_2(%arg0: i32) -> (i32, i32, i32) {
    %c0_i32 = arith.constant 0 : i32
    %c0_i32_0 = arith.constant 0 : i32
    %c0_i32_1 = arith.constant 0 : i32
    return %arg0, %c0_i32, %c0_i32_0 : i32, i32, i32
  }
}

</mosaic_0001>

<bundles_post_ra>
// kernel: tpu_custom_call.1
= control target key start
LH: loop header
LB: loop body
LE: loop exit
PB: predicated region body
PF: predicated region fallthrough
CT: control target
= control target key end

     0   :  { %7 = vsyncpa [#allocation3], 0  ;;  %s729_s0 = inlined_call_operand.hbm [shape: f32[4,8,32], index: 0, kind: input, shape index: {}]   ;;  %s730_s1 = inlined_call_operand.hbm [shape: f32[4,8,32], index: 1, kind: input, shape index: {}]   ;;  %s731_s2 = inlined_call_operand.hbm [shape: f32[4,1,128], index: 2, kind: output, shape index: {}]  }
   0x1   :  { %9 = vsyncpa [#allocation3 + $0x1], 0 }
   0x2   :  { %10 = vsyncpa [#allocation6], 0 }
   0x3   :  { %12 = vsyncpa [#allocation6 + $0x1], 0 }
   0x4   :  { %13 = vsyncpa [#allocation4], 0 }
   0x5   :  { %15 = vsyncpa [#allocation4 + $0x1], 0  ;;  %s570_s9 = smov 0   ;;  %s572_s10 = smov 0  }
   0x6   :  { %s574_s11 = smov 0   ;;  %s576_s12 = smov 0  }
   0x7 LB: > { %s591_s13 = sadd.s32 4294967295, %s553_s12   ;;  %s354_s14 = sadd.s32 4294967294, %s553_s12   ;;  %s553_s12 = sphi %s576_s12, %s741_s12   ;;  %s549_s11 = sphi %s574_s11, %s740_s11   ;;  %s545_s10 = sphi %s572_s10, %s739_s10   ;;  %s541_s9 = sphi %s570_s9, %s738_s9  }
   0x8   : > { %s595_s15 = sadd.s32 1, %s553_s12   ;;  %s28_s16 = sadd.s32 1, %s549_s11 }
   0x9   : > { %s25_s17 = ssub.s32 %s553_s12, %s595_s15  ;;  %p35_p0 = scmp.ne.s32.totalorder %s549_s11, %s545_s10 }
   0xa   : > { %p26_p1 = scmp.eq.s32.totalorder %s25_s17, 0  ;;  %p36_p2 = scmp.eq.s32.totalorder %s553_s12, 0 }
   0xb   : > { %p41_p3 = scmp.ne.s32.totalorder %s545_s10, %s541_s9  ;;  %p42_p4 = scmp.eq.s32.totalorder %s591_s13, 0 }
   0xc   : > { %s607_s18 = scalar_select %p26_p1, %s549_s11, %s28_s16  }
   0xd   : > { %p609_p5 = por %p36_p2, %p35_p0  ;;  %p613_p6 = por %p42_p4, %p41_p3 }
   0xe   : > { %p91_p7 = scmp.eq.s32.totalorder %s591_s13, 3  ;;  %p97_p8 = scmp.eq.s32.totalorder %s354_s14, 3 }
   0xf   : > { %p385_p9 = scmp.lt.s32.totalorder %s553_s12, 4  ;;  %s628_s23 = sand.u32 1, %s549_s11  }
  0x10   : > { %p619_p10 = por %p91_p7, %p35_p0  ;;  %p623_p11 = por %p97_p8, %p41_p3 }
  0x11   : > { %s358_s24 = sshll.u32 %s553_s12, 3  ;;  %s357_s25 = sshll.u32 %s628_s23, 3 }
  0x12   : > { %s125_s28 = scalar_lea.hbm %s729_s0, %s358_s24  ;;  %s121_s30 = scalar_lea.vmem [#allocation2], %s357_s25 }
  0x13   : > { %s127_s29 = sshll.u32 %s125_s28, 4  ;;  %s129_s3 = sshll.u32 %s121_s30, 4  ;;  %s128_s29 = int_to_ptr.hbm [resolvable:$true] %s127_s29  ;;  %s130_s3 = int_to_ptr.vmem [resolvable:$true] %s129_s3 }
  0x14   : > { %p637_p12 = pnand %p385_p9, %p609_p5  ;;  %p361_p13 = scmp.ge.s32.totalorder %s553_s12, 1 }
  0x15   : > { %p153_p0 = scmp.lt.s32.totalorder %s553_s12, 5  ;;  %s118_s5 = scalar_lea.sflag [#allocation3], %s628_s23 }
  0x16   : > { %s423_s6 = sshra.s32 %s128_s29, 4  ;;  %p427_p2 = pneg %p637_p12  ;;  %s424_s6 = int_to_ptr.hbm [resolvable:$true] %s423_s6 }
  0x17   : > { %s425_s7 = scalar_lea.hbm %s424_s6, 8  ;;  %s430_s16 = scalar_lea.hbm %s729_s0, 32 }
  0x18   : > { %p426_p1 = scmp.ne.s32.totalorder %s424_s6, %s425_s7  ;;  %p431_p5 = scmp.lt.s32.totalorder %s424_s6, %s729_s0 }
  0x19   : > { %p432_p7 = scmp.lt.s32.totalorder %s430_s16, %s425_s7 }
  0x1a   : > { %p428_p3 = pnand %p427_p2, %p426_p1 }
  0x1b   : > { %p433_p8 = por %p432_p7, %p431_p5 }
  0x1c   : > { %p429_p4 = pneg %p428_p3 }
  0x1e   : > { %p434_p9 = pnand %p433_p8, %p429_p4 }
  0x20   : > { %437 = shalt.err (!%p434_p9)
}
  0x21   : > { %377 = dma.hbm_to_vmem [thread:$0]  (!%p637_p12), %s128_s29, 128, %s130_s3, %s118_s5  }
  0x22   : > { %p661_p1 = pnand %p361_p13, %p153_p0  ;;  %s144_s30 = scalar_lea.hbm %s730_s1, %s358_s24 }
  0x23   : > { %s146_s6 = sshll.u32 %s144_s30, 4  ;;  %s140_s7 = scalar_lea.vmem [#allocation5], %s357_s25  ;;  %s147_s6 = int_to_ptr.hbm [resolvable:$true] %s146_s6 }
  0x24   : > { %s148_s8 = sshll.u32 %s140_s7, 4  ;;  %s137_s14 = scalar_lea.sflag [#allocation6], %s628_s23  ;;  %s149_s8 = int_to_ptr.vmem [resolvable:$true] %s148_s8 }
  0x25   : > { %s453_s16 = sshra.s32 %s147_s6, 4  ;;  %s460_s5 = scalar_lea.hbm %s730_s1, 32  ;;  %s454_s16 = int_to_ptr.hbm [resolvable:$true] %s453_s16 }
  0x26   : > { %s455_s17 = scalar_lea.hbm %s454_s16, 8  ;;  %p461_p4 = scmp.lt.s32.totalorder %s454_s16, %s730_s1 }
  0x27   : > { %p456_p3 = scmp.ne.s32.totalorder %s454_s16, %s455_s17  ;;  %p462_p5 = scmp.lt.s32.totalorder %s460_s5, %s455_s17 }
  0x29   : > { %p458_p13 = pnand %p456_p3, %p427_p2  ;;  %p463_p7 = por %p462_p5, %p461_p4 }
  0x2b   : > { %p459_p0 = pneg %p458_p13 }
  0x2d   : > { %p464_p8 = pnand %p463_p7, %p459_p0 }
  0x2f   : > { %467 = shalt.err (!%p464_p8)
}
  0x30   : > { %380 = dma.hbm_to_vmem [thread:$0]  (!%p637_p12), %s147_s6, 128, %s149_s8, %s137_s14  }
  0x31   : > { %157 = sbr.rel (%p661_p1) target bundleno = 302 (0x12e), region = 28  ;;  %s683_s23 = sand.u32 (!%p661_p1), 1, %s545_s10  }
  0x32   : > { %s362_s25 = sshll.u32 (!%p661_p1), %s683_s23, 3  ;;  %s160_s27 = scalar_lea.sflag (!%p661_p1), [#allocation3], %s683_s23 }
  0x33   : > { %s163_s28 = scalar_lea.vmem (!%p661_p1), [#allocation2], %s362_s25 }
  0x36   : > { %528 = dma.done.wait (%p613_p6), %s160_s27, 128  }
  0x37   : > { %530 = vsyncadd (%p613_p6), %s160_s27, 4294967168  ;;  %s170_s4 = scalar_lea.sflag [#allocation6], %s683_s23  ;;  %s173_s30 = scalar_lea.vmem [#allocation5], %s362_s25 }
  0x38   : > { %532 = dma.done.wait (%p613_p6), %s170_s4, 128  }
  0x39   : > { %534 = vsyncadd (%p613_p6), %s170_s4, 4294967168  ;;  %v199_v0 = vld [vmem:[%s173_s30] sm:$0xff]  ;;  %v200_v1 = vld [vmem:[%s163_s28] sm:$0xff]  ;;  %vm204_vm1 = vcmask 261120   ;;  %vm238_vm6 = vcmask 253952   ;;  %s261_s6 = scalar_lea.hbm %s731_s2, %s591_s13  ;;  %s198_s7 = scalar_lea.vmem [#allocation7], %s683_s23 }
  0x3a   : > { %vm201_vm0 = vcmp.ge.f32.partialorder %v200_v1, 0.3  ;;  %v202_v2 = vmul.f32 1.4285715, %v199_v0  ;;  %s263_s8 = sshll.u32 %s198_s7, 4  ;;  %s265_s14 = sshll.u32 %s261_s6, 4  ;;  %s264_s8 = int_to_ptr.vmem [resolvable:$true] %s263_s8  ;;  %s266_s14 = int_to_ptr.hbm [resolvable:$true] %s265_s14 }
  0x3b   : > { %s253_s29 = scalar_lea.sflag [#allocation4], %s683_s23  ;;  %s497_s3 = sshra.s32 %s266_s14, 4  ;;  %s498_s3 = int_to_ptr.hbm [resolvable:$true] %s497_s3 }
  0x3c   : > { %v203_v3 = vsel %vm201_vm0, %v202_v2, 0.0  ;;  %s499_s5 = scalar_lea.hbm %s498_s3, 1  ;;  %s503_s13 = scalar_lea.hbm %s731_s2, 4 }
  0x3d   : > { %v205_v4 = vsel %vm204_vm1, %v203_v3, -inf  ;;  %p500_p6 = scmp.ne.s32.totalorder %s498_s3, %s499_s5  ;;  %p504_p9 = scmp.lt.s32.totalorder %s498_s3, %s731_s2 }
  0x3e   : > { %v206_v5 = vrot.slane %v205_v4, 4  ;;  %p505_p1 = scmp.lt.s32.totalorder %s503_s13, %s499_s5 }
  0x3f   : > { %p501_p12 = pnand %p500_p6, %p619_p10 }
  0x40   : > { %v207_v6 = vmax.f32 %v205_v4, %v206_v5  ;;  %p506_p3 = por %p505_p1, %p504_p9 }
  0x41   : > { %p502_p2 = pneg %p501_p12 }
  0x42   : > { %v208_v7 = vrot.slane %v207_v6, 2 }
  0x43   : > { %p507_p13 = pnand %p506_p3, %p502_p2 }
  0x44   : > { %v209_v8 = vmax.f32 %v207_v6, %v208_v7 }
  0x46   : > { %v210_v9 = vrot.slane %v209_v8, 1 }
  0x48   : > { %v211_v10 = vmax.f32 %v209_v8, %v210_v9 }
  0x4a   : > { %v212_v11 = vsub.f32 %v203_v3, %v211_v10 }
  0x4c   : > { %v213_v12 = vmul.f32 1.442695, %v212_v11 }
  0x4e   : > { %419 = vpow2.f32 %v213_v12 }
  0x54   : > { %v420_v13 = vpop.eup %419 }
  0x55   : > { %v215_v14 = vsel %vm204_vm1, %v420_v13, 0.0 }
  0x56   : > { %v216_v15 = vrot.slane %v215_v14, 4 }
  0x58   : > { %v217_v16 = vadd.f32 %v216_v15, %v215_v14 }
  0x5a   : > { %v218_v17 = vrot.slane %v217_v16, 2 }
  0x5c   : > { %v219_v18 = vadd.f32 %v218_v17, %v217_v16 }
  0x5e   : > { %v220_v19 = vrot.slane %v219_v18, 1 }
  0x60   : > { %v221_v20 = vadd.f32 %v220_v19, %v219_v18 }
  0x62   : > { %421 = vrcp.f32 %v221_v20  ;;  %v233_v23 = vand.u32 2147483648, %v221_v20  ;;  %vm227_vm2 = vweird.f32 %v221_v20  ;;  %v231_v25 = vand.u32 2147483647, %v221_v20 }
  0x64   : > { %v234_v27 = vor.u32 1.1754944e-38, %v233_v23  ;;  %vm232_vm5 = vcmp.eq.f32.partialorder %v231_v25, 8.507059e+37 }
  0x68   : > { %v422_v21 = vpop.eup %421 }
  0x69   : > { %v223_v22 = vmul.f32 %v422_v21, %v221_v20  ;;  %vm228_vm3 = vweird.f32 %v422_v21 }
  0x6a   : > { %vm229_vm4 = vmor %vm227_vm2, %vm228_vm3 }
  0x6b   : > { %v224_v24 = vsub.f32 1.0, %v223_v22 }
  0x6d   : > { %v225_v26 = vmul.f32 %v422_v21, %v224_v24 }
  0x6f   : > { %v226_v28 = vadd.f32 %v422_v21, %v225_v26 }
  0x71   : > { %v230_v29 = vsel %vm229_vm4, %v422_v21, %v226_v28 }
  0x72   : > { %v235_v30 = vsel %vm232_vm5, %v234_v27, %v230_v29 }
  0x73   : > { %v237_v31 = vmul.f32 %v235_v30, %v221_v20 }
  0x75   : > { %v239_v32 = vsel %vm238_vm6, %v237_v31, 0.0 }
  0x76   : > { %240 = vadd.xlane.f32.xlu0 %v239_v32 }
  0xe9   : > { %v241_v33 = vpop.xlane.xlu0 %240 }
  0xea   : > { %v242_v34 = vrot.slane %v241_v33, 4 }
  0xec   : > { %v243_v35 = vadd.f32 %v242_v34, %v241_v33 }
  0xee   : > { %v244_v36 = vrot.slane %v243_v35, 2 }
  0xf0   : > { %v245_v37 = vadd.f32 %v244_v36, %v243_v35 }
  0xf2   : > { %v246_v38 = vrot.slane %v245_v37, 1 }
  0xf4   : > { %v247_v39 = vadd.f32 %v246_v38, %v245_v37 }
  0xf6   : > { %366 = vpush %v247_v39 }
 0x127   : > { %s367_s16 = spop %366 }
 0x128   : > { %s249_s17 = smul.f32 0.03125, %s367_s16 }
 0x12a   : > { %v250_v40 = vstv %s249_s17 }
 0x12b   : > { %251 = vst [vmem:[%s198_s7] sm:$0x1] %v250_v40 }
 0x12c   : > { %510 = shalt.err (!%p507_p13)
}
 0x12d   : > { %372 = dma.vmem_to_hbm [thread:$0]  (%p619_p10), %s264_s8, 16, %s266_s14, %s253_s29  }
 0x12e PF: > { %p386_p0 = scmp.ge.s32.totalorder %s553_s12, 2  ;;  %s277_s23 = sand.u32 1, %s541_s9  }
 0x12f   : > { %s278_s28 = scalar_lea.sflag [#allocation4], %s277_s23 }
 0x130   : > { %p382_p4 = pnand %p386_p0, %p623_p11 }
 0x132   : > { %p383_p5 = pneg %p382_p4 }
 0x134   : > { %536 = dma.done.wait (%p383_p5), %s278_s28, 16  }
 0x135   : > { %538 = vsyncadd (%p383_p5), %s278_s28, 4294967280  ;;  %p18_p7 = scmp.ge.s32.totalorder %s595_s15, 6   ;;  %s738_s9 = smov %s545_s10 }
 0x136   : > { %s739_s10 = smov %s549_s11  ;;  %s740_s11 = smov %s607_s18 }
 0x137   : > { %s741_s12 = smov %s595_s15  ;;  %20 = sbr.rel (!%p18_p7) target bundleno = 7 (0x7), region = 86 }
 0x13c   :  { %283 = vsyncpa [#allocation3], 1 }
 0x13d   :  { %285 = vsyncpa [#allocation3 + $0x1], 1 }
 0x13e   :  { %286 = vsyncpa [#allocation6], 1 }
 0x13f   :  { %288 = vsyncpa [#allocation6 + $0x1], 1 }
 0x140   :  { %289 = vsyncpa [#allocation4], 1 }
 0x141   :  { %291 = vsyncpa [#allocation4 + $0x1], 1 }

</bundles_post_ra>
